<compile_context>
chip_gen: v7x
topology: tpu7x:2x2x1
jax: 0.10.0
libtpu: 0.0.40
codegen_flags: <defaults>
</compile_context>

<pallas_src>
import numpy as np
import jax
import jax.numpy as jnp
from jax.experimental import pallas as pl
from jax.experimental.pallas import tpu as pltpu


def _stable_softplus(v):
    # Matches torch.nn.functional.softplus (linear branch above threshold),
    # avoiding overflow of log1p(exp(v)) for large v.
    return jnp.where(v > 20.0, v, jnp.log1p(jnp.exp(jnp.minimum(v, 20.0))))


def _bayes_lin_cox_kernel(x_ref, mu_w_ref, rho_w_ref, eps_w_ref,
                          mu_b_ref, rho_b_ref, eps_b_ref, o_ref):
    # softplus over the (grid-invariant) rho parameters, computed once.
    sigma_w = _stable_softplus(rho_w_ref[...])            # (1, F)
    sigma_b = _stable_softplus(rho_b_ref[...])            # (1, 1)

    # Stack all S reparameterised weight / bias samples at once.
    w_all = mu_w_ref[...] + sigma_w * eps_w_ref[...]      # (S, F)
    b_all = mu_b_ref[...] + sigma_b * eps_b_ref[...]      # (S, 1)

    # One fused MXU matmul over all MC samples, contracting over F without
    # materialising a transpose:  (S, F) . (B, F)^T -> (S, B)
    z = jax.lax.dot_general(
        w_all, x_ref[...],
        dimension_numbers=(((1,), (1,)), ((), ())),
        preferred_element_type=jnp.float32)
    o_ref[...] = (z + b_all).astype(o_ref.dtype)          # bias broadcast (S,1)


def bayes_lin_cox_forward(x, mu_w, rho_w, eps_w, mu_b, rho_b, eps_b):
    """x: (B, F); mu_w/rho_w: (1, F); eps_w: (S, 1, F);
    mu_b/rho_b: (1,); eps_b: (S, 1).
    Returns (S, B, 1) float32 — the stacked MC-sample outputs of BayesLinCox."""
    S = eps_w.shape[0]
    B, F = x.shape

    # Layout plumbing only (no compute): present 2-D operands to the kernel.
    eps_w2d = eps_w.reshape(S, F)
    mu_b2d = mu_b.reshape(1, 1).astype(jnp.float32)
    rho_b2d = rho_b.reshape(1, 1).astype(jnp.float32)
    eps_b2d = eps_b.reshape(S, 1).astype(jnp.float32)

    flops = int(2 * S * B * F + 2 * S * F + S * B)         # matmul + sampling + bias
    transcendentals = int(F + 1)                            # softplus(rho_w), softplus(rho_b)
    bytes_accessed = int(4 * (B * F + 2 * F + S * F + 2 + S + S * B))

    out = pl.pallas_call(
        _bayes_lin_cox_kernel,
        out_shape=jax.ShapeDtypeStruct((S, B), jnp.float32),
        in_specs=[pl.BlockSpec(memory_space=pltpu.MemorySpace.VMEM)] * 7,
        out_specs=pl.BlockSpec(memory_space=pltpu.MemorySpace.VMEM),
        cost_estimate=pl.CostEstimate(
            flops=flops,
            transcendentals=transcendentals,
            bytes_accessed=bytes_accessed),
    )(x, mu_w, rho_w, eps_w2d, mu_b2d, rho_b2d, eps_b2d)

    # out_features == 1: add the trailing axis outside the kernel so the kernel
    # store stays dense over the batch lanes.
    return out[:, :, None]                                  # (S, B, 1)


def reference_forward(x, mu_w, rho_w, eps_w, mu_b, rho_b, eps_b):
    """Pure-JAX reference mirroring the PyTorch forward."""
    sigma_w = jax.nn.softplus(rho_w)                        # (1, F)
    sigma_b = jax.nn.softplus(rho_b)                        # (1,)
    w = mu_w[None] + sigma_w[None] * eps_w                  # (S, 1, F)
    b = mu_b[None] + sigma_b[None] * eps_b                  # (S, 1)
    z = jnp.einsum('bf,sof->sbo', x, w) + b[:, None, :]     # (S, B, 1)
    return z


if __name__ == "__main__":
    # Small shapes consistent with the module: in_features=32, out_features=1.
    batch = 4
    in_features = 32
    n_samples = 3

    key = jax.random.PRNGKey(0)
    k_x, k_mw, k_mb, k_ew, k_eb = jax.random.split(key, 5)

    x = jax.random.normal(k_x, (batch, in_features), dtype=jnp.float32)

    # Deterministic synthetic parameters (Bayes-by-backprop style init).
    mu_w = 0.1 * jax.random.normal(k_mw, (1, in_features), dtype=jnp.float32)
    rho_w = jnp.full((1, in_features), -3.0, dtype=jnp.float32)
    mu_b = 0.1 * jax.random.normal(k_mb, (1,), dtype=jnp.float32)
    rho_b = jnp.full((1,), -3.0, dtype=jnp.float32)

    # Fixed reparameterisation noise (one draw per MC sample).
    eps_w = jax.random.normal(k_ew, (n_samples, 1, in_features), dtype=jnp.float32)
    eps_b = jax.random.normal(k_eb, (n_samples, 1), dtype=jnp.float32)

    out = bayes_lin_cox_forward(x, mu_w, rho_w, eps_w, mu_b, rho_b, eps_b)
    out = jax.block_until_ready(out)

    ref = reference_forward(x, mu_w, rho_w, eps_w, mu_b, rho_b, eps_b)
    assert out.shape == (n_samples, batch, 1), out.shape
    np.testing.assert_allclose(np.asarray(out), np.asarray(ref),
                               rtol=1e-5, atol=1e-5)

    print("KERNEL_OK")
</pallas_src>

<mosaic_0001>
module attributes {stable_mosaic.version = 11 : i64} {
  func.func @_bayes_lin_cox_kernel(%arg0: memref<4x32xf32, #tpu.memory_space<vmem>>, %arg1: memref<1x32xf32, #tpu.memory_space<vmem>>, %arg2: memref<1x32xf32, #tpu.memory_space<vmem>>, %arg3: memref<3x32xf32, #tpu.memory_space<vmem>>, %arg4: memref<1x1xf32, #tpu.memory_space<vmem>>, %arg5: memref<1x1xf32, #tpu.memory_space<vmem>>, %arg6: memref<3x1xf32, #tpu.memory_space<vmem>>, %arg7: memref<3x4xf32, #tpu.memory_space<vmem>>) attributes {dimension_semantics = [], scalar_prefetch = 0 : i64, scratch_operands = 0 : i64, tpu.core_type = #tpu.core_type<tc>} {
    %c0 = arith.constant 0 : index
    %c0_0 = arith.constant 0 : index
    %0 = vector.load %arg2[%c0, %c0_0] : memref<1x32xf32, #tpu.memory_space<vmem>>, vector<1x32xf32>
    %cst = arith.constant 2.000000e+01 : f32
    %1 = vector.broadcast %cst : f32 to vector<1x32xf32>
    %2 = arith.cmpf ogt, %0, %1 : vector<1x32xf32>
    %cst_1 = arith.constant 2.000000e+01 : f32
    %3 = vector.broadcast %cst_1 : f32 to vector<1x32xf32>
    %4 = arith.minimumf %0, %3 : vector<1x32xf32>
    %5 = math.exp %4 : vector<1x32xf32>
    %6 = math.log1p %5 : vector<1x32xf32>
    %7 = arith.select %2, %0, %6 : vector<1x32xi1>, vector<1x32xf32>
    %c0_2 = arith.constant 0 : index
    %c0_3 = arith.constant 0 : index
    %8 = vector.load %arg5[%c0_2, %c0_3] : memref<1x1xf32, #tpu.memory_space<vmem>>, vector<1x1xf32>
    %cst_4 = arith.constant 2.000000e+01 : f32
    %9 = vector.broadcast %cst_4 : f32 to vector<1x1xf32>
    %10 = arith.cmpf ogt, %8, %9 : vector<1x1xf32>
    %cst_5 = arith.constant 2.000000e+01 : f32
    %11 = vector.broadcast %cst_5 : f32 to vector<1x1xf32>
    %12 = arith.minimumf %8, %11 : vector<1x1xf32>
    %13 = math.exp %12 : vector<1x1xf32>
    %14 = math.log1p %13 : vector<1x1xf32>
    %15 = arith.select %10, %8, %14 : vector<1x1xi1>, vector<1x1xf32>
    %c0_6 = arith.constant 0 : index
    %c0_7 = arith.constant 0 : index
    %16 = vector.load %arg1[%c0_6, %c0_7] : memref<1x32xf32, #tpu.memory_space<vmem>>, vector<1x32xf32>
    %c0_8 = arith.constant 0 : index
    %c0_9 = arith.constant 0 : index
    %17 = vector.load %arg3[%c0_8, %c0_9] : memref<3x32xf32, #tpu.memory_space<vmem>>, vector<3x32xf32>
    %18 = vector.broadcast %7 : vector<1x32xf32> to vector<3x32xf32>
    %19 = arith.mulf %18, %17 : vector<3x32xf32>
    %20 = vector.broadcast %16 : vector<1x32xf32> to vector<3x32xf32>
    %21 = arith.addf %20, %19 : vector<3x32xf32>
    %c0_10 = arith.constant 0 : index
    %c0_11 = arith.constant 0 : index
    %22 = vector.load %arg4[%c0_10, %c0_11] : memref<1x1xf32, #tpu.memory_space<vmem>>, vector<1x1xf32>
    %c0_12 = arith.constant 0 : index
    %c0_13 = arith.constant 0 : index
    %23 = vector.load %arg6[%c0_12, %c0_13] : memref<3x1xf32, #tpu.memory_space<vmem>>, vector<3x1xf32>
    %24 = vector.broadcast %15 : vector<1x1xf32> to vector<3x1xf32>
    %25 = arith.mulf %24, %23 : vector<3x1xf32>
    %26 = vector.broadcast %22 : vector<1x1xf32> to vector<3x1xf32>
    %27 = arith.addf %26, %25 : vector<3x1xf32>
    %c0_14 = arith.constant 0 : index
    %c0_15 = arith.constant 0 : index
    %28 = vector.load %arg0[%c0_14, %c0_15] : memref<4x32xf32, #tpu.memory_space<vmem>>, vector<4x32xf32>
    %cst_16 = arith.constant dense<0.000000e+00> : vector<3x4xf32>
    %29 = tpu.matmul %21, %28, %cst_16 {dimension_numbers = #tpu.dot_dimension_numbers<[1], [1], [0], [0], [0, 0, 1, 0], [], []>} : vector<3x32xf32>, vector<4x32xf32>, vector<3x4xf32> -> vector<3x4xf32>
    %30 = vector.broadcast %27 : vector<3x1xf32> to vector<3x4xf32>
    %31 = arith.addf %29, %30 : vector<3x4xf32>
    %c0_17 = arith.constant 0 : index
    %c0_18 = arith.constant 0 : index
    %32 = vector.load %arg7[%c0_17, %c0_18] : memref<3x4xf32, #tpu.memory_space<vmem>>, vector<3x4xf32>
    tpu.vector_store %arg7[%c0_17, %c0_18], %31 {strides = array<i32>} : memref<3x4xf32, #tpu.memory_space<vmem>>, vector<3x4xf32>,
    return
  }
}

</mosaic_0001>

<bundles_post_ra>
// kernel: tpu_custom_call.1
= control target key start
LH: loop header
LB: loop body
LE: loop exit
PB: predicated region body
PF: predicated region fallthrough
CT: control target
= control target key end

     0   :  { %s319_s0 = inlined_call_operand.vmem [shape: f32[4,32], index: 0, kind: input, shape index: {}]   ;;  %s320_s1 = inlined_call_operand.vmem [shape: f32[1,32], index: 1, kind: input, shape index: {}]   ;;  %s321_s2 = inlined_call_operand.vmem [shape: f32[1,32], index: 2, kind: input, shape index: {}]   ;;  %s322_s3 = inlined_call_operand.vmem [shape: f32[3,32], index: 3, kind: input, shape index: {}]   ;;  %s323_s4 = inlined_call_operand.<no memory space> [shape: f32[1,1], index: 4, kind: input, shape index: {}]   ;;  %s324_s6 = inlined_call_operand.vmem [shape: f32[3,1], index: 6, kind: input, shape index: {}]   ;;  %s325_s7 = inlined_call_operand.hbm [shape: f32[3,4], index: 7, kind: output, shape index: {}]   ;;  %s326_s5 = inlined_call_operand.<no memory space> [shape: f32[1,1], index: 5, kind: input, shape index: {}]  }
   0x1   :  { %v12_v0 = vstv %s323_s4  ;;  %v14_v1 = vstv %s326_s5 }
   0x2   :  { %13 = vst [vmem:[#allocation2] sm:$0x1] %v12_v0  ;;  %15 = vst [vmem:[#allocation3] sm:$0x1] %v14_v1 }
   0x3   :  { %v93_v2 = vld [vmem:[%s319_s0] sm:$0xf]  ;;  %vm99_vm0 = vcmask 261120   ;;  %v240_v3 = vmov 0.0   ;;  %vm241_vm1 = vmmov 0   ;;  %v242_v7 = vmov 0  }
   0x4   :  { %198 = vmatprep.subr.mxu0 %v240_v3  ;;  %200 = vmatprep.mubr.msk.f32.mxu0 %vm241_vm1, %v240_v3  ;;  %v31_v4 = vld [vmem:[%s321_s2] sm:$0x1] }
   0x5   :  { %199 = vmatpush3.xpose.msk.msra.mxu0 %vm99_vm0, %v93_v2  ;;  %v33_v5 = vmin.f32 %v31_v4, 20.0  ;;  %207 = vset.pattern.permute.xlu0 %v242_v7 }
   0x7   :  { %v34_v9 = vmul.f32 1.442695, %v33_v5 }
   0x9   :  { %v46_v6 = vld [vmem:[#allocation3] sm:$0x1] }
   0xa   :  { %v48_v8 = vmin.f32 %v46_v6, 20.0 }
   0xb   :  { %16 = vsyncpa [#allocation5], 0  ;;  %208 = vpow2.f32 %v34_v9  ;;  %v64_v17 = vlaneseq  ;;  %vm32_vm3 = vcmp.gt.f32.partialorder %v31_v4, 20.0  ;;  %vm47_vm5 = vcmp.gt.f32.partialorder %v46_v6, 20.0  ;;  %v62_v32 = vld [vmem:[%s322_s3] sm:$0x7] }
   0xc   :  { %v49_v10 = vmul.f32 1.442695, %v48_v8  ;;  %v78_v36 = vld [vmem:[%s324_s6] sm:$0x7]  ;;  %s243_s3 = smov [#allocation4]   ;;  %vm176_vm6 = vcmask 26624  }
   0xd   :  { %v65_v21 = vshrl.u32 %v64_v17, 7  ;;  %v192_v37 = vld [vmem:[%s320_s1] ss:$0 sm:$0xff]  ;;  %s184_s11 = sshll.u32 %s243_s3, 4  ;;  %s185_s11 = int_to_ptr.vmem [resolvable:$true] %s184_s11 }
   0xe   :  { %210 = vpow2.f32 %v49_v10  ;;  %v193_v40 = vld [vmem:[#allocation2] ss:$0 sm:$0xff]  ;;  %s216_s6 = scalar_lea.vmem %s185_s11, 64  ;;  %p221_p1 = scmp.lt.s32.totalorder %s185_s11, %s185_s11 }
   0xf   :  { %v66_v28 = vsub.s32 0, %v65_v21  ;;  %p217_p0 = scmp.ne.s32.totalorder %s185_s11, %s216_s6  ;;  %p222_p2 = scmp.lt.s32.totalorder %s216_s6, %s216_s6 }
  0x11   :  { %p223_p3 = por %p222_p2, %p221_p1 }
  0x13   :  { %p224_p4 = pnand %p223_p3, %p217_p0 }
  0x15   :  { %v209_v11 = vpop.eup %208 }
  0x16   :  { %v36_v13 = vadd.f32 1.0, %v209_v11  ;;  %v39_v15 = vmul.f32 -0.5, %v209_v11  ;;  %v42_v19 = vand.u32 2147483647, %v209_v11 }
  0x18   :  { %v211_v12 = vpop.eup %210  ;;  %212 = vlog2.f32 %v36_v13  ;;  %v40_v18 = vadd.f32 1.0, %v39_v15  ;;  %vm43_vm2 = vcmp.lt.f32.partialorder %v42_v19, 0.0004427343 }
  0x19   :  { %v51_v14 = vadd.f32 1.0, %v211_v12  ;;  %v54_v16 = vmul.f32 -0.5, %v211_v12  ;;  %v57_v22 = vand.u32 2147483647, %v211_v12 }
  0x1a   :  { %v41_v23 = vmul.f32 %v209_v11, %v40_v18 }
  0x1b   :  { %214 = vlog2.f32 %v51_v14  ;;  %v55_v20 = vadd.f32 1.0, %v54_v16  ;;  %vm58_vm4 = vcmp.lt.f32.partialorder %v57_v22, 0.0004427343 }
  0x1d   :  { %v56_v25 = vmul.f32 %v211_v12, %v55_v20 }
  0x22   :  { %v213_v24 = vpop.eup %212 }
  0x23   :  { %v38_v27 = vmul.f32 0.6931472, %v213_v24 }
  0x25   :  { %v215_v26 = vpop.eup %214  ;;  %v44_v30 = vsel %vm43_vm2, %v41_v23, %v38_v27 }
  0x26   :  { %v53_v29 = vmul.f32 0.6931472, %v215_v26  ;;  %v45_v31 = vsel %vm32_vm3, %v31_v4, %v44_v30 }
  0x27   :  { %v67_v34 = vrot.slane %v45_v31, %v66_v28 }
  0x28   :  { %v59_v33 = vsel %vm58_vm4, %v56_v25, %v53_v29 }
  0x29   :  { %v60_v35 = vsel %vm47_vm5, %v46_v6, %v59_v33  ;;  %v69_v39 = vmul.f32 %v67_v34, %v62_v32 }
  0x2a   :  { %v83_v38 = vrot.slane %v60_v35, %v66_v28 }
  0x2b   :  { %v76_v42 = vadd.f32 %v192_v37, %v69_v39 }
  0x2c   :  { %v85_v41 = vmul.f32 %v83_v38, %v78_v36 }
  0x2d   :  { %201 = vmatmul.mubr.msk.f32.vlgmr.msra.gmra.mrb[0].mxu0 %vm99_vm0, %v76_v42 }
  0x2e   :  { %v92_v43 = vadd.f32 %v193_v40, %v85_v41 }
  0x30   :  { %96 = vperm.xlu0 %207, %v92_v43  }
  0xaf   :  { %v97_v44 = vpop.permute.xlu0 %96 }
 0x100   :  { %v172_v45 = vpop.f32.mrb[0].mxu0 }
 0x101   :  { %v173_v46 = vadd.f32 %v172_v45, %v97_v44  ;;  %v202_v47 = vpop.f32.mrb[1].mxu0 }
 0x103   :  { %177 = vst.msk [vmem:[#allocation4] sm:$0x7] %vm176_vm6, %v173_v46 }
 0x104   :  { %227 = shalt.err (!%p224_p4)
}
 0x105   :  { %s228_s13 = scalar_lea.hbm %s325_s7, 64 }
 0x106   :  { %p229_p5 = scmp.ne.s32.totalorder %s325_s7, %s228_s13  ;;  %p232_p6 = scmp.lt.u32.totalorder %s228_s13, %s325_s7 }
 0x108   :  { %p234_p7 = pnand %p232_p6, %p229_p5 }
 0x10a   :  { %237 = shalt.err (!%p234_p7)
}
 0x10b   :  { %187 = dma.vmem_to_hbm [thread:$0]  %s185_s11, 64, %s325_s7, [#allocation5]  }
 0x10c   :  { %238 = dma.done.wait [#allocation5], 64  }
 0x10d   :  { %239 = vsyncadd [#allocation5], 4294967232 }
 0x10e   :  { %191 = vsyncpa [#allocation5], 1 }

</bundles_post_ra>
